<compile_context>
chip_gen: v7x
topology: tpu7x:2x2x1
jax: 0.10.0
libtpu: 0.0.40
codegen_flags: <defaults>
</compile_context>

<pallas_src>
import functools

import jax
import jax.numpy as jnp
from jax import lax
from jax.experimental import pallas as pl
from jax.experimental.pallas import tpu as pltpu


def _gather_small_kernel(ids_ref, table_ref, out_ref):
    """Whole table resident in VMEM: one matmul per batch tile.

    ids_ref   : VMEM int32, (TB, 1)
    table_ref : VMEM,       (N, D)   -- full embedding table (constant block)
    out_ref   : VMEM,       (TB, D)
    """
    tb = ids_ref.shape[0]
    n = table_ref.shape[0]
    ids = ids_ref[...]                                      # (TB, 1)
    cols = lax.broadcasted_iota(jnp.int32, (tb, n), 1)       # (TB, N)
    onehot = (ids == cols).astype(table_ref.dtype)           # exact 0/1 weights
    out_ref[...] = jnp.dot(
        onehot, table_ref[...], preferred_element_type=jnp.float32
    ).astype(out_ref.dtype)


def _gather_tiled_kernel(ids_ref, table_ref, out_ref, acc_ref, *, n_valid):
    """Large table: stream (TN, D) blocks along the reduction (last) grid axis.

    ids_ref   : VMEM int32, (TB, 1)
    table_ref : VMEM,       (TN, D)
    out_ref   : VMEM,       (TB, D)   -- resident across k
    acc_ref   : VMEM f32,   (TB, D)
    n_valid   : static int, true number of rows in the table
    """
    k = pl.program_id(1)
    tb = ids_ref.shape[0]
    tn = table_ref.shape[0]

    @pl.when(k == 0)
    def _init():
        acc_ref[...] = jnp.zeros_like(acc_ref)

    ids = ids_ref[...]                                             # (TB, 1)
    cols = lax.broadcasted_iota(jnp.int32, (tb, tn), 1) + k * tn   # (TB, TN)
    onehot = (ids == cols).astype(table_ref.dtype)

    tblk = table_ref[...]
    if n_valid % tn != 0:
        # Last block is partial: rows past n_valid hold unspecified data and
        # 0 * NaN would poison the accumulation, so zero them out (VPU mul).
        row_valid = (
            lax.broadcasted_iota(jnp.int32, (tn, 1), 0) + k * tn
        ) < n_valid
        tblk = tblk * row_valid.astype(tblk.dtype)

    acc_ref[...] += jnp.dot(onehot, tblk, preferred_element_type=jnp.float32)

    @pl.when(k == pl.num_programs(1) - 1)
    def _store():
        out_ref[...] = acc_ref[...].astype(out_ref.dtype)


def speaker_embeddings(speaker_ids, embed_table):
    """Pallas equivalent of SpeakerEmbeddings.forward(speaker_ids).

    speaker_ids : integer array of any shape
    embed_table : (num_speakers, speaker_dims) float array
    returns     : (*speaker_ids.shape, speaker_dims)
    """
    ids_shape = speaker_ids.shape
    N, D = embed_table.shape
    dtype = embed_table.dtype
    itemsize = jnp.dtype(dtype).itemsize

    # Clamp ids so an invalid id never reads garbage (jnp.take-style clamping;
    # PyTorch nn.Embedding would raise instead).
    ids_flat = jnp.clip(speaker_ids.reshape(-1).astype(jnp.int32), 0, N - 1)
    B = ids_flat.shape[0]

    # Batch tile: sublane-aligned so output stores are full unmasked vst.
    sub = 8 if itemsize >= 4 else 16
    TB = min(256, ((B + sub - 1) // sub) * sub)
    nb = pl.cdiv(B, TB)
    B_pad = nb * TB
    if B_pad != B:
        ids_flat = jnp.concatenate(
            [ids_flat, jnp.zeros((B_pad - B,), jnp.int32)]
        )
    ids_2d = ids_flat.reshape(B_pad, 1)

    table_bytes = N * D * itemsize
    small = table_bytes <= (8 << 20)

    if small:
        # Whole table resident, single "parallel" grid axis over the batch.
        est_vmem = (
            table_bytes              # table block (constant -> effectively 1 buf)
            + 2 * TB * D * itemsize  # output tile, double-buffered
            + 2 * TB * 4             # ids tile
            + TB * D * 4             # f32 matmul result
            + (2 << 20)              # headroom
        )
        vmem_limit = est_vmem if est_vmem > (16 << 20) else None
        out = pl.pallas_call(
            _gather_small_kernel,
            out_shape=jax.ShapeDtypeStruct((B_pad, D), dtype),
            grid_spec=pltpu.PrefetchScalarGridSpec(
                num_scalar_prefetch=0,
                grid=(nb,),
                in_specs=[
                    pl.BlockSpec((TB, 1), lambda b: (b, 0)),  # ids tile
                    pl.BlockSpec((N, D), lambda b: (0, 0)),   # full table
                ],
                out_specs=pl.BlockSpec((TB, D), lambda b: (b, 0)),
            ),
            compiler_params=pltpu.CompilerParams(
                dimension_semantics=("parallel",),
                vmem_limit_bytes=vmem_limit,
            ),
        )(ids_2d, embed_table)
    else:
        # Stream the table along the (last, "arbitrary") reduction axis.
        TN = 512
        nk = pl.cdiv(N, TN)
        est_vmem = (
            2 * TN * D * itemsize    # table block, double-buffered
            + 2 * TB * D * itemsize  # output tile, double-buffered
            + 2 * TB * 4             # ids tile
            + TB * D * 4             # f32 accumulator scratch
            + (2 << 20)              # headroom
        )
        vmem_limit = est_vmem if est_vmem > (16 << 20) else None
        out = pl.pallas_call(
            functools.partial(_gather_tiled_kernel, n_valid=N),
            out_shape=jax.ShapeDtypeStruct((B_pad, D), dtype),
            grid_spec=pltpu.PrefetchScalarGridSpec(
                num_scalar_prefetch=0,
                grid=(nb, nk),
                in_specs=[
                    pl.BlockSpec((TB, 1), lambda b, k: (b, 0)),  # ids tile
                    pl.BlockSpec((TN, D), lambda b, k: (k, 0)),  # table block
                ],
                out_specs=pl.BlockSpec((TB, D), lambda b, k: (b, 0)),
                scratch_shapes=[pltpu.VMEM((TB, D), jnp.float32)],
            ),
            compiler_params=pltpu.CompilerParams(
                dimension_semantics=("parallel", "arbitrary"),
                vmem_limit_bytes=vmem_limit,
            ),
        )(ids_2d, embed_table)

    return out[:B].reshape(*ids_shape, D)


if __name__ == "__main__":
    num_speakers = 16
    speaker_dims = 128   # module default

    key = jax.random.PRNGKey(0)
    k_table, k_ids = jax.random.split(key)

    # nn.Embedding default init: weight ~ N(0, 1)
    embed_table = jax.random.normal(
        k_table, (num_speakers, speaker_dims), dtype=jnp.float32
    )

    # batch of speaker ids, shape (2, 8) -> output (2, 8, 128)
    speaker_ids = jax.random.randint(
        k_ids, (2, 8), minval=0, maxval=num_speakers, dtype=jnp.int32
    )

    out = speaker_embeddings(speaker_ids, embed_table)
    out = jax.block_until_ready(out)

    # pure-JAX reference (same semantics as torch.nn.Embedding lookup)
    ref = jnp.take(embed_table, speaker_ids, axis=0)

    assert out.shape == (2, 8, speaker_dims), out.shape
    assert out.dtype == embed_table.dtype
    assert jnp.array_equal(out, ref), "mismatch vs reference gather"

    print("KERNEL_OK")
</pallas_src>

<mosaic_0001>
module attributes {stable_mosaic.version = 11 : i64} {
  func.func @_gather_small_kernel(%arg0: i32, %arg1: memref<16x1xi32, #tpu.memory_space<vmem>>, %arg2: memref<16x128xf32, #tpu.memory_space<vmem>>, %arg3: memref<16x128xf32, #tpu.memory_space<vmem>>) attributes {dimension_semantics = [#tpu.dimension_semantics<parallel>], iteration_bounds = array<i64: 1>, scalar_prefetch = 0 : i64, scratch_operands = 0 : i64, tpu.core_type = #tpu.core_type<tc>, window_params = [{transform_indices = @transform_0, window_bounds = array<i64: 16, 1>}, {pipeline_mode = #tpu.pipeline_mode<synchronous>, transform_indices = @transform_1, window_bounds = array<i64: 16, 128>}, {transform_indices = @transform_2, window_bounds = array<i64: 16, 128>}]} {
    %c0 = arith.constant 0 : index
    %c0_0 = arith.constant 0 : index
    %0 = vector.load %arg1[%c0, %c0_0] : memref<16x1xi32, #tpu.memory_space<vmem>>, vector<16x1xi32>
    %1 = tpu.iota {dimensions = array<i32: 1>} : vector<16x16xi32>
    %2 = vector.broadcast %0 : vector<16x1xi32> to vector<16x16xi32>
    %3 = arith.cmpi eq, %2, %1 : vector<16x16xi32>
    %4 = arith.extui %3 : vector<16x16xi1> to vector<16x16xi32>
    %5 = arith.sitofp %4 : vector<16x16xi32> to vector<16x16xf32>
    %c0_1 = arith.constant 0 : index
    %c0_2 = arith.constant 0 : index
    %6 = vector.load %arg2[%c0_1, %c0_2] : memref<16x128xf32, #tpu.memory_space<vmem>>, vector<16x128xf32>
    %cst = arith.constant dense<0.000000e+00> : vector<16x128xf32>
    %7 = tpu.matmul %5, %6, %cst {dimension_numbers = #tpu.dot_dimension_numbers<[1], [0], [0], [1], [0, 0, 1, 1], [], []>} : vector<16x16xf32>, vector<16x128xf32>, vector<16x128xf32> -> vector<16x128xf32>
    %c0_3 = arith.constant 0 : index
    %c0_4 = arith.constant 0 : index
    %8 = vector.load %arg3[%c0_3, %c0_4] : memref<16x128xf32, #tpu.memory_space<vmem>>, vector<16x128xf32>
    tpu.vector_store %arg3[%c0_3, %c0_4], %7 {strides = array<i32>} : memref<16x128xf32, #tpu.memory_space<vmem>>, vector<16x128xf32>,
    return
  }
  func.func @transform_0(%arg0: i32) -> (i32, i32) {
    %c0_i32 = arith.constant 0 : i32
    %c0_i32_0 = arith.constant 0 : i32
    return %arg0, %c0_i32 : i32, i32
  }
  func.func @transform_1(%arg0: i32) -> (i32, i32) {
    %c0_i32 = arith.constant 0 : i32
    %c0_i32_0 = arith.constant 0 : i32
    %c0_i32_1 = arith.constant 0 : i32
    return %c0_i32, %c0_i32_0 : i32, i32
  }
  func.func @transform_2(%arg0: i32) -> (i32, i32) {
    %c0_i32 = arith.constant 0 : i32
    %c0_i32_0 = arith.constant 0 : i32
    return %arg0, %c0_i32 : i32, i32
  }
}

</mosaic_0001>

<bundles_post_ra>
// kernel: tpu_custom_call.1
= control target key start
LH: loop header
LB: loop body
LE: loop exit
PB: predicated region body
PF: predicated region fallthrough
CT: control target
= control target key end

     0   :  { %s223_s0 = inlined_call_operand.vmem [shape: s32[16,1], index: 0, kind: input, shape index: {}]   ;;  %s224_s1 = inlined_call_operand.vmem [shape: f32[16,128], index: 1, kind: input, shape index: {}]   ;;  %s225_s2 = inlined_call_operand.hbm [shape: f32[16,128], index: 2, kind: output, shape index: {}]  }
   0x1   :  { %v12_v0 = vld [vmem:[%s223_s0] sm:$0xff] }
   0x2   :  { %7 = vsyncpa [#allocation3], 0  ;;  %v179_v1 = vmov 0   ;;  %v28_v2 = vld [vmem:[%s224_s1] sm:$0xff]  ;;  %v29_v3 = vld [vmem:[%s224_s1 + $0x8] sm:$0xff]  ;;  %v14_v6 = vlaneseq  ;;  %vm30_vm0 = vcmask 130048  }
   0x3   :  { %154 = vset.pattern.permute.xlu0 %v179_v1  ;;  %v145_v4 = vpack.c.bf16 %v29_v3, %v28_v2  ;;  %v13_v5 = vld [vmem:[%s223_s0 + $0x8] sm:$0xff]  ;;  %v180_v9 = vmov 0.0   ;;  %s181_s1 = smov [#allocation2]  }
   0x4   :  { %17 = vperm.xlu0 %154, %v12_v0   ;;  %v15_v7 = vand.u32 127, %v14_v6  ;;  %s119_s17 = sshll.u32 %s181_s1, 4  ;;  %s120_s17 = int_to_ptr.vmem [resolvable:$true] %s119_s17 }
   0x5   :  { %146 = vmatprep.subr.bf16.mxu0 %v145_v4  ;;  %s155_s0 = scalar_lea.vmem %s120_s17, 256  ;;  %p160_p1 = scmp.lt.s32.totalorder %s120_s17, %s120_s17 }
   0x6   :  { %148 = vmatpush3.bf16.msra.mxu0 %v145_v4  ;;  %p156_p0 = scmp.ne.s32.totalorder %s120_s17, %s155_s0  ;;  %p161_p2 = scmp.lt.s32.totalorder %s155_s0, %s155_s0 }
   0x8   :  { %20 = vperm.xlu0 %154, %v13_v5   ;;  %p162_p3 = por %p161_p2, %p160_p1 }
   0xa   :  { %p163_p4 = pnand %p162_p3, %p156_p0 }
  0x83   :  { %v18_v8 = vpop.permute.xlu0 %17 }
  0x84   :  { %vm22_vm1 = vcmp.eq.s32.totalorder %v18_v8, %v15_v7 }
  0x85   :  { %v130_v10 = vsel %vm22_vm1, 1.0, %v180_v9 }
  0x86   :  { %142 = vmatprep.mubr.msk.f32.mxu0 %vm30_vm0, %v130_v10 }
  0x87   :  { %v21_v11 = vpop.permute.xlu0 %20 }
  0x88   :  { %vm23_vm2 = vcmp.eq.s32.totalorder %v21_v11, %v15_v7 }
  0x89   :  { %v131_v12 = vsel %vm23_vm2, 1.0, %v180_v9 }
  0x8a   :  { %143 = vmatmul.mubr.msk.f32.vlgmr.msra.gmra.mrb[0].mxu0 %vm30_vm0, %v131_v12 }
 0x15d   :  { %v144_v13 = vpop.f32.mrb[0].mxu0 }
 0x15e   :  { %113 = vst [vmem:[#allocation2 + $0x8] sm:$0xff] %v144_v13  ;;  %v103_v14 = vpop.f32.mrb[1].mxu0 }
 0x15f   :  { %112 = vst [vmem:[#allocation2] sm:$0xff] %v103_v14 }
 0x160   :  { %166 = shalt.err (!%p163_p4)
}
 0x161   :  { %s167_s20 = scalar_lea.hbm %s225_s2, 256 }
 0x162   :  { %p168_p5 = scmp.ne.s32.totalorder %s225_s2, %s167_s20  ;;  %p171_p6 = scmp.lt.u32.totalorder %s167_s20, %s225_s2 }
 0x164   :  { %p173_p7 = pnand %p171_p6, %p168_p5 }
 0x166   :  { %176 = shalt.err (!%p173_p7)
}
 0x167   :  { %s182_s25 = smov 128   ;;  %s183_s26 = smov 8  }
 0x168   :  { %125 = dma.vmem_to_hbm [thread:$0]  %s120_s17, 256, %s225_s2, [#allocation3], %s182_s25, %s182_s25, %s183_s26  }
 0x169   :  { %177 = dma.done.wait [#allocation3], 256  }
 0x16a   :  { %178 = vsyncadd [#allocation3], 4294967040 }
 0x16b   :  { %129 = vsyncpa [#allocation3], 1 }

</bundles_post_ra>
